<compile_context>
chip_gen: v7x
topology: tpu7x:2x2x1
jax: 0.10.0
libtpu: 0.0.40
codegen_flags: <defaults>
</compile_context>

<pallas_src>
import numpy as np
import jax
import jax.numpy as jnp
from jax.experimental import pallas as pl
from jax.experimental.pallas import tpu as pltpu


# ITU-R BT.601 (full range) BGR -> YUV444 coefficients.
# Rows: Y, U, V.  Columns correspond to input channels in (B, G, R) order.
_BGR2YUV_WEIGHT = np.array(
    [
        [0.114, 0.587, 0.299],        # Y
        [0.5, -0.331264, -0.168736],  # U
        [-0.081312, -0.418688, 0.5],  # V
    ],
    dtype=np.float32,
)
_YUV_BIAS = (0.0, 128.0, 128.0)

_TARGET_BLOCK_BYTES = 3 << 20   # ~3 MiB per block per direction (f32 accounting)
_VMEM_LIMIT_BYTES = 48 << 20    # safe on v5e/v6e (128 MiB phys) and v7x (64 MiB)


def _make_kernel(weight, bias, out_dtype):
    """Build a Pallas kernel with the 3x3 color matrix baked in as constants."""
    w = [[float(weight[c][k]) for k in range(3)] for c in range(3)]
    b = [float(bias[c]) for c in range(3)]
    is_int = jnp.issubdtype(jnp.dtype(out_dtype), jnp.integer)
    if is_int:
        ii = jnp.iinfo(out_dtype)
        lo, hi = float(ii.min), float(ii.max)

    def kernel(x_ref, o_ref):
        # Block shape: (1, 3, TILE, LANES).  Up-cast each channel plane once to
        # f32 (no-op for f32 inputs), weighted sums on the VPU in f32, cast
        # back only at the store.
        c0 = x_ref[0, 0].astype(jnp.float32)
        c1 = x_ref[0, 1].astype(jnp.float32)
        c2 = x_ref[0, 2].astype(jnp.float32)
        for c in range(3):  # unrolled at trace time
            acc = w[c][0] * c0 + w[c][1] * c1 + w[c][2] * c2
            if b[c] != 0.0:  # Y bias is 0.0 -> skip the add
                acc = acc + b[c]
            if is_int:
                # Integer outputs: round + saturate (plain astype would truncate).
                acc = jnp.clip(jnp.round(acc), lo, hi)
            o_ref[0, c] = acc.astype(o_ref.dtype)

    return kernel


def _row_tile(rows, row_bytes, n_batch):
    """Pick the row-tile size for a (rows, lanes) slab of 3 channels."""
    cap = max(8, (_TARGET_BLOCK_BYTES // max(row_bytes, 1)) // 8 * 8)
    if rows <= cap:
        # Whole extent fits in one block.  If that would collapse the grid to
        # (1, 1) (N == 1), split the rows so both v7x TensorCores get work.
        if n_batch == 1 and rows >= 16:
            return -(-((rows + 1) // 2) // 8) * 8   # ceil(rows/2) -> multiple of 8
        return rows                                 # full extent (always legal)
    return cap                                      # multiple of 8; ragged last block OK


def _launch(x4, weight, n, rows, lanes):
    """Run the kernel on x4 of shape (n, 3, rows, lanes)."""
    tile = _row_tile(rows, 3 * lanes * 4, n)
    grid = (n, pl.cdiv(rows, tile))
    kernel = _make_kernel(weight, _YUV_BIAS, x4.dtype)

    npix = n * rows * lanes
    cost = pl.CostEstimate(
        flops=17 * npix,                                    # 9 mul + ~8 add per pixel
        transcendentals=0,
        bytes_accessed=2 * 3 * npix * x4.dtype.itemsize,    # read + write, 3 channels
    )

    return pl.pallas_call(
        kernel,
        out_shape=jax.ShapeDtypeStruct((n, 3, rows, lanes), x4.dtype),
        grid_spec=pltpu.PrefetchScalarGridSpec(
            num_scalar_prefetch=0,
            grid=grid,
            in_specs=[pl.BlockSpec((1, 3, tile, lanes), lambda i, r: (i, 0, r, 0))],
            out_specs=pl.BlockSpec((1, 3, tile, lanes), lambda i, r: (i, 0, r, 0)),
        ),
        compiler_params=pltpu.CompilerParams(
            dimension_semantics=("parallel", "parallel"),
            vmem_limit_bytes=_VMEM_LIMIT_BYTES,
        ),
        cost_estimate=cost,
    )(x4)


def bgr_to_yuv444(x, channel_reversal=False):
    """Pallas implementation of changan_plugin_pytorch bgr_to_yuv444.

    Args:
      x: (N, 3, H, W) array, BGR order (RGB if channel_reversal=True).
      channel_reversal: static bool, True if input channels are R, G, B.
    Returns:
      (N, 3, H, W) array of Y, U, V planes, same dtype as x.
    """
    assert isinstance(channel_reversal, bool)
    N, C, H, W = x.shape
    assert C == 3, "bgr_to_yuv444 expects a 3-channel input"

    weight = _BGR2YUV_WEIGHT
    if channel_reversal:
        # Input is RGB: permuting input channels (2,1,0) == permuting weight cols.
        weight = weight[:, ::-1]

    # Fast path: rows are already lane-dense -> tile NCHW directly, no reshape.
    if W % 128 == 0:
        return _launch(x, weight, N, H, W)

    M = H * W
    # Slab path: pixels are position independent, flatten H*W and reshape to a
    # lane-dense slab.  LANES divides M, so the reshape is layout-preserving
    # (free) and no pad / output slice is needed.
    lanes = next((l for l in (512, 256, 128) if M % l == 0), None)
    if lanes is not None:
        rows = M // lanes
        out = _launch(x.reshape(N, 3, rows, lanes), weight, N, rows, lanes)
        return out.reshape(N, 3, H, W)

    # Rare fallback: M not a multiple of 128 -> pad to a lane-dense slab and
    # slice the result (costs one extra HBM round trip; uncommon shapes only).
    lanes = 128
    rows = -(-M // lanes)
    m_pad = rows * lanes
    x_flat = jnp.pad(x.reshape(N, 3, M), ((0, 0), (0, 0), (0, m_pad - M)))
    out = _launch(x_flat.reshape(N, 3, rows, lanes), weight, N, rows, lanes)
    return out.reshape(N, 3, m_pad)[:, :, :M].reshape(N, 3, H, W)


def _reference(x, channel_reversal=False):
    """Pure-JAX reference (f32 math, same op order as the kernel)."""
    w = _BGR2YUV_WEIGHT
    if channel_reversal:
        w = w[:, ::-1]
    xf = x.astype(jnp.float32)
    c0, c1, c2 = xf[:, 0], xf[:, 1], xf[:, 2]
    planes = []
    for c in range(3):
        acc = float(w[c][0]) * c0 + float(w[c][1]) * c1 + float(w[c][2]) * c2
        acc = acc + _YUV_BIAS[c]
        planes.append(acc)
    out = jnp.stack(planes, axis=1)
    if jnp.issubdtype(x.dtype, jnp.integer):
        ii = jnp.iinfo(x.dtype)
        out = jnp.clip(jnp.round(out), ii.min, ii.max)
    return out.astype(x.dtype)


if __name__ == "__main__":
    key = jax.random.PRNGKey(0)

    # (shape, channel_reversal, dtype) cases:
    #  - 2x3x16x128 : W % 128 == 0 fast path (no reshape at all).
    #  - 2x3x16x16  : M=256  -> slab path, LANES=256, no pad.
    #  - 1x3x8x20   : M=160  -> rare fallback pad/slice path.
    #  - 1x3x64x96  : M=6144 -> slab path, LANES=512, no pad.
    #  - 2x3x32x128 : uint8, exercises the round + saturate integer path.
    cases = [
        ((2, 3, 16, 128), False, jnp.float32),
        ((2, 3, 16, 16), True, jnp.float32),
        ((1, 3, 8, 20), False, jnp.float32),
        ((1, 3, 64, 96), True, jnp.float32),
        ((2, 3, 32, 128), False, jnp.uint8),
    ]

    for shape, rev, dtype in cases:
        key, sub = jax.random.split(key)
        if dtype == jnp.uint8:
            x = jax.random.randint(sub, shape, 0, 256, dtype=jnp.int32).astype(jnp.uint8)
            atol = 1.0   # tolerate 1 LSB on round-to-nearest boundary pixels
        else:
            x = jax.random.uniform(sub, shape, dtype=dtype, minval=0.0, maxval=255.0)
            atol = 1e-3
        out = jax.block_until_ready(bgr_to_yuv444(x, channel_reversal=rev))
        ref = _reference(x, channel_reversal=rev)
        np.testing.assert_allclose(
            np.asarray(out).astype(np.float32),
            np.asarray(ref).astype(np.float32),
            rtol=1e-5, atol=atol)

    print("KERNEL_OK")
</pallas_src>

<mosaic_0001>
module attributes {stable_mosaic.version = 11 : i64} {
  func.func @kernel(%arg0: i32, %arg1: i32, %arg2: memref<1x3x16x128xf32, #tpu.memory_space<vmem>>, %arg3: memref<1x3x16x128xf32, #tpu.memory_space<vmem>>) attributes {dimension_semantics = [#tpu.dimension_semantics<parallel>, #tpu.dimension_semantics<parallel>], iteration_bounds = array<i64: 2, 1>, scalar_prefetch = 0 : i64, scratch_operands = 0 : i64, tpu.core_type = #tpu.core_type<tc>, window_params = [{transform_indices = @transform_0, window_bounds = array<i64: 1, 3, 16, 128>}, {transform_indices = @transform_1, window_bounds = array<i64: 1, 3, 16, 128>}]} {
    %c0 = arith.constant 0 : index
    %c0_0 = arith.constant 0 : index
    %c0_1 = arith.constant 0 : index
    %c0_2 = arith.constant 0 : index
    %0 = vector.load %arg2[%c0, %c0_0, %c0_1, %c0_2] : memref<1x3x16x128xf32, #tpu.memory_space<vmem>>, vector<1x1x16x128xf32>
    %1 = vector.shape_cast %0 : vector<1x1x16x128xf32> to vector<16x128xf32>
    %c0_3 = arith.constant 0 : index
    %c1 = arith.constant 1 : index
    %c0_4 = arith.constant 0 : index
    %c0_5 = arith.constant 0 : index
    %2 = vector.load %arg2[%c0_3, %c1, %c0_4, %c0_5] : memref<1x3x16x128xf32, #tpu.memory_space<vmem>>, vector<1x1x16x128xf32>
    %3 = vector.shape_cast %2 : vector<1x1x16x128xf32> to vector<16x128xf32>
    %c0_6 = arith.constant 0 : index
    %c2 = arith.constant 2 : index
    %c0_7 = arith.constant 0 : index
    %c0_8 = arith.constant 0 : index
    %4 = vector.load %arg2[%c0_6, %c2, %c0_7, %c0_8] : memref<1x3x16x128xf32, #tpu.memory_space<vmem>>, vector<1x1x16x128xf32>
    %5 = vector.shape_cast %4 : vector<1x1x16x128xf32> to vector<16x128xf32>
    %cst = arith.constant 1.140000e-01 : f32
    %6 = vector.broadcast %cst : f32 to vector<16x128xf32>
    %7 = arith.mulf %6, %1 : vector<16x128xf32>
    %cst_9 = arith.constant 5.870000e-01 : f32
    %8 = vector.broadcast %cst_9 : f32 to vector<16x128xf32>
    %9 = arith.mulf %8, %3 : vector<16x128xf32>
    %10 = arith.addf %7, %9 : vector<16x128xf32>
    %cst_10 = arith.constant 2.990000e-01 : f32
    %11 = vector.broadcast %cst_10 : f32 to vector<16x128xf32>
    %12 = arith.mulf %11, %5 : vector<16x128xf32>
    %13 = arith.addf %10, %12 : vector<16x128xf32>
    %c0_11 = arith.constant 0 : index
    %c0_12 = arith.constant 0 : index
    %c0_13 = arith.constant 0 : index
    %c0_14 = arith.constant 0 : index
    %14 = vector.load %arg3[%c0_11, %c0_12, %c0_13, %c0_14] : memref<1x3x16x128xf32, #tpu.memory_space<vmem>>, vector<1x1x16x128xf32>
    %15 = vector.shape_cast %14 : vector<1x1x16x128xf32> to vector<16x128xf32>
    %16 = vector.shape_cast %13 : vector<16x128xf32> to vector<1x1x16x128xf32>
    tpu.vector_store %arg3[%c0_11, %c0_12, %c0_13, %c0_14], %16 {strides = array<i32>} : memref<1x3x16x128xf32, #tpu.memory_space<vmem>>, vector<1x1x16x128xf32>,
    %cst_15 = arith.constant 5.000000e-01 : f32
    %17 = vector.broadcast %cst_15 : f32 to vector<16x128xf32>
    %18 = arith.mulf %17, %1 : vector<16x128xf32>
    %cst_16 = arith.constant -3.312640e-01 : f32
    %19 = vector.broadcast %cst_16 : f32 to vector<16x128xf32>
    %20 = arith.mulf %19, %3 : vector<16x128xf32>
    %21 = arith.addf %18, %20 : vector<16x128xf32>
    %cst_17 = arith.constant -1.687360e-01 : f32
    %22 = vector.broadcast %cst_17 : f32 to vector<16x128xf32>
    %23 = arith.mulf %22, %5 : vector<16x128xf32>
    %24 = arith.addf %21, %23 : vector<16x128xf32>
    %cst_18 = arith.constant 1.280000e+02 : f32
    %25 = vector.broadcast %cst_18 : f32 to vector<16x128xf32>
    %26 = arith.addf %24, %25 : vector<16x128xf32>
    %c0_19 = arith.constant 0 : index
    %c1_20 = arith.constant 1 : index
    %c0_21 = arith.constant 0 : index
    %c0_22 = arith.constant 0 : index
    %27 = vector.load %arg3[%c0_19, %c1_20, %c0_21, %c0_22] : memref<1x3x16x128xf32, #tpu.memory_space<vmem>>, vector<1x1x16x128xf32>
    %28 = vector.shape_cast %27 : vector<1x1x16x128xf32> to vector<16x128xf32>
    %29 = vector.shape_cast %26 : vector<16x128xf32> to vector<1x1x16x128xf32>
    tpu.vector_store %arg3[%c0_19, %c1_20, %c0_21, %c0_22], %29 {strides = array<i32>} : memref<1x3x16x128xf32, #tpu.memory_space<vmem>>, vector<1x1x16x128xf32>,
    %cst_23 = arith.constant -8.131200e-02 : f32
    %30 = vector.broadcast %cst_23 : f32 to vector<16x128xf32>
    %31 = arith.mulf %30, %1 : vector<16x128xf32>
    %cst_24 = arith.constant -4.186880e-01 : f32
    %32 = vector.broadcast %cst_24 : f32 to vector<16x128xf32>
    %33 = arith.mulf %32, %3 : vector<16x128xf32>
    %34 = arith.addf %31, %33 : vector<16x128xf32>
    %cst_25 = arith.constant 5.000000e-01 : f32
    %35 = vector.broadcast %cst_25 : f32 to vector<16x128xf32>
    %36 = arith.mulf %35, %5 : vector<16x128xf32>
    %37 = arith.addf %34, %36 : vector<16x128xf32>
    %cst_26 = arith.constant 1.280000e+02 : f32
    %38 = vector.broadcast %cst_26 : f32 to vector<16x128xf32>
    %39 = arith.addf %37, %38 : vector<16x128xf32>
    %c0_27 = arith.constant 0 : index
    %c2_28 = arith.constant 2 : index
    %c0_29 = arith.constant 0 : index
    %c0_30 = arith.constant 0 : index
    %40 = vector.load %arg3[%c0_27, %c2_28, %c0_29, %c0_30] : memref<1x3x16x128xf32, #tpu.memory_space<vmem>>, vector<1x1x16x128xf32>
    %41 = vector.shape_cast %40 : vector<1x1x16x128xf32> to vector<16x128xf32>
    %42 = vector.shape_cast %39 : vector<16x128xf32> to vector<1x1x16x128xf32>
    tpu.vector_store %arg3[%c0_27, %c2_28, %c0_29, %c0_30], %42 {strides = array<i32>} : memref<1x3x16x128xf32, #tpu.memory_space<vmem>>, vector<1x1x16x128xf32>,
    return
  }
  func.func @transform_0(%arg0: i32, %arg1: i32) -> (i32, i32, i32, i32) {
    %c0_i32 = arith.constant 0 : i32
    %c0_i32_0 = arith.constant 0 : i32
    %c0_i32_1 = arith.constant 0 : i32
    return %arg0, %c0_i32, %arg1, %c0_i32_0 : i32, i32, i32, i32
  }
  func.func @transform_1(%arg0: i32, %arg1: i32) -> (i32, i32, i32, i32) {
    %c0_i32 = arith.constant 0 : i32
    %c0_i32_0 = arith.constant 0 : i32
    %c0_i32_1 = arith.constant 0 : i32
    return %arg0, %c0_i32, %arg1, %c0_i32_0 : i32, i32, i32, i32
  }
}

</mosaic_0001>

<bundles_post_ra>
// kernel: tpu_custom_call.1
= control target key start
LH: loop header
LB: loop body
LE: loop exit
PB: predicated region body
PF: predicated region fallthrough
CT: control target
= control target key end

     0   :  { %6 = vsyncpa [#allocation3], 0  ;;  %s704_s0 = inlined_call_operand.hbm [shape: f32[2,3,16,128], index: 0, kind: input, shape index: {}]   ;;  %s705_s1 = inlined_call_operand.hbm [shape: f32[2,3,16,128], index: 1, kind: output, shape index: {}]  }
   0x1   :  { %8 = vsyncpa [#allocation3 + $0x1], 0 }
   0x2   :  { %9 = vsyncpa [#allocation4], 0 }
   0x3   :  { %11 = vsyncpa [#allocation4 + $0x1], 0  ;;  %s525_s6 = smov 0   ;;  %s527_s7 = smov 0  }
   0x4   :  { %s529_s8 = smov 0   ;;  %s531_s9 = smov 0  }
   0x5   :  { %s533_s10 = smov 0   ;;  %s535_s11 = smov 0  }
   0x6 LB: > { %s308_s12 = sadd.s32 4294967295, %s507_s11   ;;  %s309_s13 = sadd.s32 4294967294, %s507_s11   ;;  %s507_s11 = sphi %s535_s11, %s17_s11   ;;  %s503_s10 = sphi %s533_s10, %s720_s10   ;;  %s499_s9 = sphi %s531_s9, %s719_s9   ;;  %s495_s8 = sphi %s529_s8, %s718_s8   ;;  %s491_s7 = sphi %s527_s7, %s717_s7   ;;  %s487_s6 = sphi %s525_s6, %s716_s6  }
   0x7   : > { %s29_s14 = sadd.s32 1, %s503_s10  ;;  %s38_s15 = sadd.s32 1, %s495_s8 }
   0x8   : > { %p31_p0 = scmp.ge.s32.totalorder %s29_s14, 2  ;;  %p45_p1 = scmp.ne.s32.totalorder %s495_s8, %s491_s7 }
   0x9   : > { %p46_p2 = scmp.eq.s32.totalorder %s507_s11, 0  ;;  %p51_p3 = scmp.ne.s32.totalorder %s491_s7, %s487_s6 }
   0xa   : > { %s722_s14 = smov (%p31_p0, %s29_s14), 0  ;;  %p52_p5 = scmp.eq.s32.totalorder %s308_s12, 0 }
   0xb   : > { %p566_p4 = por %p46_p2, %p45_p1  ;;  %s33_s17 = ssub.s32 %s503_s10, %s722_s14 }
   0xc   : > { %p77_p6 = scmp.eq.s32.totalorder %s308_s12, 1  ;;  %p36_p7 = scmp.eq.s32.totalorder %s33_s17, 0 }
   0xd   : > { %p572_p8 = por %p52_p5, %p51_p3  ;;  %p83_p10 = scmp.eq.s32.totalorder %s309_s13, 1 }
   0xe   : > { %p576_p9 = por %p77_p6, %p45_p1  ;;  %p341_p13 = scmp.lt.s32.totalorder %s507_s11, 2 }
   0xf   : > { %s581_s20 = scalar_select %p36_p7, %s495_s8, %s38_s15  }
  0x10   : > { %s709_s19 = scalar_select %p576_p9, 1, 0 }
  0x11   : > { %p583_p11 = por %p83_p10, %p51_p3  ;;  %s103_s22 = sand.u32 1, %s495_s8  }
  0x12   : > { %s325_s23 = smul.u32 48, %s103_s22  ;;  %p593_p0 = pnand %p341_p13, %p566_p4 }
  0x13   : > { %s710_s21 = scalar_select %p583_p11, 1, 0 }
  0x14   : > { %s326_s24 = smul.u32 768, %s503_s10  ;;  %s107_s29 = scalar_lea.vmem [#allocation2], %s325_s23 }
  0x15   : > { %s116_s30 = sshll.u32 %s107_s29, 4  ;;  %s605_s2 = scalar_lea.sflag [#allocation3], %s103_s22  ;;  %s602_s30 = int_to_ptr.vmem [resolvable:$true] %s116_s30 }
  0x16   : > { %s600_s28 = scalar_lea.hbm %s704_s0, %s326_s24  ;;  %p397_p3 = pneg %p593_p0 }
  0x17   : > { %s395_s3 = scalar_lea.hbm %s600_s28, 768  ;;  %s400_s12 = scalar_lea.hbm %s704_s0, 1536 }
  0x18   : > { %p396_p2 = scmp.ne.s32.totalorder %s600_s28, %s395_s3  ;;  %p401_p6 = scmp.lt.u32.totalorder %s600_s28, %s704_s0 }
  0x19   : > { %p402_p7 = scmp.lt.u32.totalorder %s400_s12, %s395_s3  ;;  %p404_p13 = scmp.lt.u32.totalorder %s395_s3, %s600_s28 }
  0x1a   : > { %p398_p4 = pnand %p397_p3, %p396_p2 }
  0x1b   : > { %p403_p10 = por %p402_p7, %p401_p6 }
  0x1c   : > { %p399_p5 = pneg %p398_p4 }
  0x1d   : > { %p405_p12 = por %p404_p13, %p403_p10 }
  0x1f   : > { %p406_p1 = pnand %p405_p12, %p399_p5 }
  0x21   : > { %409 = shalt.err (!%p406_p1)
}
  0x22   : > { %s410_s16 = scalar_lea.vmem %s602_s30, 768  ;;  %s509_s17 = smov [#allocation2]  }
  0x23   : > { %p411_p2 = scmp.ne.s32.totalorder %s602_s30, %s410_s16  ;;  %s415_s22 = sshll.u32 %s509_s17, 4  ;;  %s416_s22 = int_to_ptr.vmem [resolvable:$false] %s415_s22 }
  0x24   : > { %s417_s23 = scalar_lea.vmem %s416_s22, 1536  ;;  %p418_p9 = scmp.lt.s32.totalorder %s602_s30, %s416_s22 }
  0x25   : > { %p413_p4 = pnand %p411_p2, %p397_p3  ;;  %p419_p6 = scmp.lt.s32.totalorder %s417_s23, %s410_s16 }
  0x27   : > { %p414_p11 = pneg %p413_p4  ;;  %p420_p7 = por %p419_p6, %p418_p9 }
  0x29   : > { %p421_p10 = pnand %p420_p7, %p414_p11 }
  0x2b   : > { %424 = shalt.err (!%p421_p10)
}
  0x2c   : > { %s510_s24 = smov 128   ;;  %s511_s26 = smov 8  }
  0x2d   : > { %336 = dma.hbm_to_vmem [thread:$0]  (!%p593_p0), %s600_s28, 768, %s602_s30, %s605_s2, %s510_s24, %s510_s24, %s511_s26  }
  0x2e   : > { %p124_p12 = scmp.lt.s32.totalorder %s507_s11, 3  ;;  %p712_p1 = scmp.ge.s32.totalorder %s507_s11, 1 }
  0x30   : > { %p125_p3 = pnand %p712_p1, %p124_p12 }
  0x31   : > { %s637_s27 = sand.u32 (!%p125_p3), 1, %s491_s7  }
  0x32   : > { %128 = sbr.rel (%p125_p3) target bundleno = 89 (0x59), region = 24  ;;  %s131_s3 = scalar_lea.sflag (!%p125_p3), [#allocation3], %s637_s27 }
  0x33   : > { %s327_s29 = smul.u32 (!%p125_p3), 48, %s637_s27 }
  0x35   : > { %s134_s4 = scalar_lea.vmem (!%p125_p3), [#allocation2], %s327_s29 }
  0x39   : > { %478 = dma.done.wait (%p572_p8), %s131_s3, 768  }
  0x3a   : > { %480 = vsyncadd (%p572_p8), %s131_s3, 4294966528  ;;  %v155_v0 = vld [vmem:[%s134_s4] sm:$0xff]  ;;  %v314_v1 = vld [vmem:[%s134_s4 + $0x10] sm:$0xff]  ;;  %s152_s18 = scalar_lea.vmem [#allocation5], %s327_s29  ;;  %s328_s28 = smul.u32 768, %s499_s9 }
  0x3b   : > { %v316_v2 = vld [vmem:[%s134_s4 + $0x20] sm:$0xff]  ;;  %v163_v3 = vmul.f32 0.114, %v155_v0  ;;  %v165_v4 = vmul.f32 0.587, %v314_v1  ;;  %v156_v6 = vld [vmem:[%s134_s4 + $0x8] sm:$0xff] }
  0x3c   : > { %v169_v5 = vmul.f32 0.299, %v316_v2  ;;  %v315_v7 = vld [vmem:[%s134_s4 + $0x18] sm:$0xff]  ;;  %v317_v8 = vld [vmem:[%s134_s4 + $0x28] sm:$0xff]  ;;  %v175_v9 = vmul.f32 0.5, %v155_v0  ;;  %v176_v17 = vmul.f32 0.5, %v156_v6  ;;  %s655_s5 = scalar_lea.hbm %s705_s1, %s328_s28 }
  0x3d   : > { %v177_v10 = vmul.f32 -0.331264, %v314_v1  ;;  %v167_v11 = vadd.f32 %v165_v4, %v163_v3  ;;  %v164_v12 = vmul.f32 0.114, %v156_v6  ;;  %v166_v13 = vmul.f32 0.587, %v315_v7 }
  0x3e   : > { %v170_v14 = vmul.f32 0.299, %v317_v8  ;;  %v181_v16 = vmul.f32 -0.168736, %v316_v2  ;;  %v178_v18 = vmul.f32 -0.331264, %v315_v7 }
  0x3f   : > { %v179_v15 = vadd.f32 %v177_v10, %v175_v9  ;;  %v171_v19 = vadd.f32 %v169_v5, %v167_v11  ;;  %v168_v20 = vadd.f32 %v166_v13, %v164_v12  ;;  %v182_v21 = vmul.f32 -0.168736, %v317_v8  ;;  %s221_s25 = sshll.u32 %s152_s18, 4  ;;  %s206_s9 = scalar_lea.sflag [#allocation4], %s637_s27  ;;  %s650_s25 = int_to_ptr.vmem [resolvable:$true] %s221_s25 }
  0x40   : > { %v190_v22 = vmul.f32 -0.081312, %v155_v0  ;;  %v180_v24 = vadd.f32 %v178_v18, %v176_v17  ;;  %v192_v25 = vmul.f32 -0.418688, %v314_v1  ;;  %v196_v26 = vmul.f32 0.5, %v316_v2  ;;  %s425_s12 = scalar_lea.vmem %s650_s25, 768 }
  0x41   : > { %v183_v23 = vadd.f32 %v181_v16, %v179_v15  ;;  %173 = vst [vmem:[%s152_s18] sm:$0xff] %v171_v19  ;;  %v172_v27 = vadd.f32 %v170_v14, %v168_v20  ;;  %v191_v28 = vmul.f32 -0.081312, %v156_v6  ;;  %v193_v29 = vmul.f32 -0.418688, %v315_v7  ;;  %p426_p8 = scmp.ne.s32.totalorder %s650_s25, %s425_s12  ;;  %p713_p9 = scmp.ne.s32.totalorder %s709_s19, 0 }
  0x42   : > { %v197_v30 = vmul.f32 0.5, %v317_v8  ;;  %v184_v32 = vadd.f32 %v182_v21, %v180_v24  ;;  %v194_v33 = vadd.f32 %v192_v25, %v190_v22  ;;  %s512_s13 = smov [#allocation5]  }
  0x43   : > { %v185_v31 = vadd.f32 128.0, %v183_v23  ;;  %174 = vst [vmem:[%s152_s18 + $0x8] sm:$0xff] %v172_v27  ;;  %v195_v34 = vadd.f32 %v193_v29, %v191_v28  ;;  %p427_p11 = pnand %p426_p8, %p713_p9  ;;  %s429_s15 = sshll.u32 %s512_s13, 4  ;;  %s430_s15 = int_to_ptr.vmem [resolvable:$false] %s429_s15 }
  0x44   : > { %v186_v35 = vadd.f32 128.0, %v184_v32  ;;  %v198_v36 = vadd.f32 %v196_v26, %v194_v33  ;;  %s431_s16 = scalar_lea.vmem %s430_s15, 1536  ;;  %p432_p5 = scmp.lt.s32.totalorder %s650_s25, %s430_s15 }
  0x45   : > { %318 = vst [vmem:[%s152_s18 + $0x10] sm:$0xff] %v185_v31  ;;  %v199_v37 = vadd.f32 %v197_v30, %v195_v34  ;;  %p428_p0 = pneg %p427_p11  ;;  %p433_p13 = scmp.lt.s32.totalorder %s431_s16, %s425_s12 }
  0x46   : > { %319 = vst [vmem:[%s152_s18 + $0x18] sm:$0xff] %v186_v35  ;;  %v200_v38 = vadd.f32 128.0, %v198_v36 }
  0x47   : > { %v201_v39 = vadd.f32 128.0, %v199_v37  ;;  %p434_p2 = por %p433_p13, %p432_p5 }
  0x48   : > { %320 = vst [vmem:[%s152_s18 + $0x20] sm:$0xff] %v200_v38 }
  0x49   : > { %321 = vst [vmem:[%s152_s18 + $0x28] sm:$0xff] %v201_v39  ;;  %p435_p4 = pnand %p434_p2, %p428_p0 }
  0x4b   : > { %438 = shalt.err (!%p435_p4)
}
  0x4c   : > { %s439_s17 = scalar_lea.hbm %s655_s5, 768  ;;  %s443_s24 = scalar_lea.hbm %s705_s1, 1536 }
  0x4d   : > { %p440_p6 = scmp.ne.s32.totalorder %s655_s5, %s439_s17  ;;  %p444_p12 = scmp.lt.u32.totalorder %s655_s5, %s705_s1 }
  0x4e   : > { %p445_p1 = scmp.lt.u32.totalorder %s443_s24, %s439_s17  ;;  %p447_p8 = scmp.lt.u32.totalorder %s439_s17, %s655_s5 }
  0x4f   : > { %p441_p7 = pnand %p440_p6, %p713_p9 }
  0x50   : > { %p446_p3 = por %p445_p1, %p444_p12 }
  0x51   : > { %p442_p10 = pneg %p441_p7 }
  0x52   : > { %p448_p11 = por %p447_p8, %p446_p3 }
  0x54   : > { %p449_p0 = pnand %p448_p11, %p442_p10 }
  0x56   : > { %452 = shalt.err (!%p449_p0)
}
  0x57   : > { %s513_s3 = smov 128   ;;  %s514_s4 = smov 8  }
  0x58   : > { %331 = dma.vmem_to_hbm [thread:$0]  (%p713_p9), %s650_s25, 768, %s655_s5, %s206_s9, %s513_s3, %s513_s3, %s514_s4  }
  0x59 PF: > { %s236_s18 = sand.u32 1, %s487_s6   ;;  %p714_p5 = scmp.ne.s32.totalorder %s710_s21, 0 }
  0x5a   : > { %p715_p13 = scmp.ge.s32.totalorder %s507_s11, 2  ;;  %s237_s28 = scalar_lea.sflag [#allocation4], %s236_s18 }
  0x5c   : > { %p338_p2 = pnand %p715_p13, %p714_p5 }
  0x5e   : > { %482 = dma.done.wait (!%p338_p2), %s237_s28, 768  }
  0x5f   : > { %484 = vsyncadd (!%p338_p2), %s237_s28, 4294966528  ;;  %s17_s11 = sadd.s32 1, %s507_s11   ;;  %s716_s6 = smov %s491_s7 }
  0x60   : > { %p14_p4 = scmp.ge.s32.totalorder %s17_s11, 4   ;;  %s717_s7 = smov %s495_s8 }
  0x61   : > { %s718_s8 = smov %s581_s20  ;;  %s719_s9 = smov %s503_s10 }
  0x62   : > { %s720_s10 = smov %s722_s14  ;;  %16 = sbr.rel (!%p14_p4) target bundleno = 6 (0x6), region = 73 }
  0x69   :  { %242 = vsyncpa [#allocation3], 1 }
  0x6a   :  { %244 = vsyncpa [#allocation3 + $0x1], 1 }
  0x6b   :  { %245 = vsyncpa [#allocation4], 1 }
  0x6c   :  { %247 = vsyncpa [#allocation4 + $0x1], 1 }

</bundles_post_ra>
